<compile_context>
chip_gen: v7x
topology: tpu7x:2x2x1
jax: 0.10.0
libtpu: 0.0.40
codegen_flags: <defaults>
</compile_context>

<pallas_src>
import functools

import jax
import jax.numpy as jnp
from jax.experimental import pallas as pl
from jax.experimental.pallas import tpu as pltpu


def _round_up(x, m):
    return ((x + m - 1) // m) * m


def _pick_tile_b(batch, max_tile=512):
    """Batch tile: multiple of 8 sublanes, big enough to amortize per-grid-step
    overhead, but >=2 tiles when the batch allows (megacore sharding on v7x)."""
    b8 = _round_up(max(batch, 1), 8)
    tile = min(max_tile, b8)
    if b8 > 8 and b8 // tile < 2:
        tile = _round_up((b8 + 1) // 2, 8)
    return tile


def _fused_mlp_kernel(*refs, n_layers):
    """Fused MLP on one batch tile.

    refs = (x_ref, w_0, b_0, ..., w_{L-1}, b_{L-1}, o_ref)
      x_ref : [tile_b, pad_in_0]
      w_l   : [pad_in_l, pad_out_l]   VMEM-resident (single-buffered)
      b_l   : [1, pad_out_l]          row, implicit sublane broadcast
      o_ref : [tile_b, pad_out_last]  lane-dense store
    """
    x_ref = refs[0]
    o_ref = refs[-1]
    h = x_ref[...]
    for l in range(n_layers):                      # static, fully unrolled
        w = refs[1 + 2 * l][...]
        b = refs[2 + 2 * l][...]
        y = jnp.dot(h, w, preferred_element_type=jnp.float32) + b
        h = jnp.tanh(y)
    # sigmoid(x) == 0.5 * tanh(0.5 * x) + 0.5 : single EUP op instead of
    # exp + divide, relieving the binding EUP slot on v6e/v7x.
    o_ref[...] = (0.5 * jnp.tanh(0.5 * h) + 0.5).astype(o_ref.dtype)


def feedforward_forward(x, params, *, max_tile_b=512):
    """Pallas forward matching ParameterFeedforwardNeuralNetModel.forward.

    x      : [batch, in_dim] float array
    params : list of (w [in, out], b [out]) per Linear layer
             (w is torch.nn.Linear.weight transposed).
    """
    n_layers = len(params)
    batch, in_dim = x.shape
    feat = [in_dim] + [w.shape[1] for (w, _) in params]
    out_dim = feat[-1]

    # Per-layer lane-dense padding (no shared max-dim padding).
    pads = [_round_up(d, 128) for d in feat]

    tile_b = _pick_tile_b(batch, max_tile_b)
    b_pad = _round_up(batch, tile_b)

    # Zero-pad activations. Padded weight rows/cols and biases are zero, so
    # padded columns stay exactly 0 through every tanh layer (sliced off after).
    xp = jnp.zeros((b_pad, pads[0]), jnp.float32)
    xp = xp.at[:batch, :in_dim].set(x.astype(jnp.float32))

    flat_wb = []
    for l, (w, b) in enumerate(params):
        fi, fo = w.shape
        pi, po = pads[l], pads[l + 1]
        wp = jnp.zeros((pi, po), jnp.float32).at[:fi, :fo].set(w.astype(jnp.float32))
        bp = jnp.zeros((1, po), jnp.float32).at[0, :fo].set(
            jnp.reshape(b, (-1,)).astype(jnp.float32))
        flat_wb += [wp, bp]

    # VMEM budget: single-buffered weights/biases + double-buffered activation
    # tiles + intermediate-activation headroom.
    weight_bytes = 4 * sum(pads[l] * pads[l + 1] + pads[l + 1] for l in range(n_layers))
    act_bytes = 4 * tile_b * (2 * pads[0] + 2 * pads[-1] + 2 * max(pads))
    vmem_limit = int(min(64 * 2**20,
                         max(32 * 2**20, int(1.5 * (weight_bytes + act_bytes)))))

    # Advisory cost estimate (real, unpadded dims) for XLA scheduling.
    cost = pl.CostEstimate(
        flops=2 * batch * sum(feat[l] * feat[l + 1] for l in range(n_layers)),
        transcendentals=batch * (sum(feat[1:]) + out_dim),
        bytes_accessed=4 * (batch * (in_dim + out_dim)
                            + sum(feat[l] * feat[l + 1] + feat[l + 1]
                                  for l in range(n_layers))),
    )

    kernel = functools.partial(_fused_mlp_kernel, n_layers=n_layers)

    def call(single_buffer_weights):
        # Constant index_map keeps weights VMEM-resident across batch tiles;
        # Buffered(1) drops the default (useless) double buffer for them.
        wkw = dict(pipeline_mode=pl.Buffered(1)) if single_buffer_weights else {}
        in_specs = [pl.BlockSpec((tile_b, pads[0]), lambda i: (i, 0))]
        for l in range(n_layers):
            in_specs.append(
                pl.BlockSpec((pads[l], pads[l + 1]), lambda i: (0, 0), **wkw))
            in_specs.append(
                pl.BlockSpec((1, pads[l + 1]), lambda i: (0, 0), **wkw))
        return pl.pallas_call(
            kernel,
            out_shape=jax.ShapeDtypeStruct((b_pad, pads[-1]), jnp.float32),
            grid_spec=pltpu.PrefetchScalarGridSpec(
                num_scalar_prefetch=0,
                grid=(b_pad // tile_b,),
                in_specs=in_specs,
                out_specs=pl.BlockSpec((tile_b, pads[-1]), lambda i: (i, 0)),
            ),
            compiler_params=pltpu.CompilerParams(
                dimension_semantics=("parallel",),
                vmem_limit_bytes=vmem_limit,
            ),
            cost_estimate=cost,
        )(xp, *flat_wb)

    try:
        out = jax.block_until_ready(call(True))
    except Exception:
        # Fallback if this JAX build rejects pipeline_mode=Buffered(1) on a
        # top-level pallas_call BlockSpec; semantics are identical.
        out = call(False)

    return out[:batch, :out_dim]


def init_params(dimensions, key):
    """Deterministic PyTorch-style init: U(-1/sqrt(fan_in), 1/sqrt(fan_in))."""
    params = []
    for i in range(1, len(dimensions)):
        fan_in, fan_out = dimensions[i - 1], dimensions[i]
        key, kw, kb = jax.random.split(key, 3)
        bound = 1.0 / jnp.sqrt(jnp.float32(fan_in))
        w = jax.random.uniform(kw, (fan_in, fan_out), jnp.float32, -bound, bound)
        b = jax.random.uniform(kb, (fan_out,), jnp.float32, -bound, bound)
        params.append((w, b))
    return params


def feedforward_reference(x, params):
    """Pure-JAX f32 reference for validation."""
    x = x.astype(jnp.float32)
    for w, b in params:
        x = jnp.tanh(x @ w + b.reshape(1, -1))
    return jax.nn.sigmoid(x)


if __name__ == "__main__":
    key = jax.random.PRNGKey(0)
    dimensions = [16, 32, 32, 8]   # same role as the `dimensions` ctor arg
    batch = 4

    key, kx = jax.random.split(key)
    x = jax.random.normal(kx, (batch, dimensions[0]), jnp.float32)

    params = init_params(dimensions, key)

    out = feedforward_forward(x, params)
    out = jax.block_until_ready(out)

    ref = feedforward_reference(x, params)
    assert out.shape == (batch, dimensions[-1])
    assert jnp.allclose(out, ref, atol=1e-5, rtol=1e-5), "mismatch vs reference"

    print("KERNEL_OK")
</pallas_src>

<mosaic_0001>
module attributes {stable_mosaic.version = 11 : i64} {
  func.func @_fused_mlp_kernel(%arg0: i32, %arg1: memref<8x128xf32, #tpu.memory_space<vmem>>, %arg2: memref<128x128xf32, #tpu.memory_space<vmem>>, %arg3: memref<1x128xf32, #tpu.memory_space<vmem>>, %arg4: memref<128x128xf32, #tpu.memory_space<vmem>>, %arg5: memref<1x128xf32, #tpu.memory_space<vmem>>, %arg6: memref<128x128xf32, #tpu.memory_space<vmem>>, %arg7: memref<1x128xf32, #tpu.memory_space<vmem>>, %arg8: memref<8x128xf32, #tpu.memory_space<vmem>>) attributes {dimension_semantics = [#tpu.dimension_semantics<parallel>], iteration_bounds = array<i64: 1>, scalar_prefetch = 0 : i64, scratch_operands = 0 : i64, tpu.core_type = #tpu.core_type<tc>, window_params = [{transform_indices = @transform_0, window_bounds = array<i64: 8, 128>}, {pipeline_mode = #tpu.pipeline_mode<synchronous>, transform_indices = @transform_1, window_bounds = array<i64: 128, 128>}, {pipeline_mode = #tpu.pipeline_mode<synchronous>, transform_indices = @transform_2, window_bounds = array<i64: 1, 128>}, {pipeline_mode = #tpu.pipeline_mode<synchronous>, transform_indices = @transform_3, window_bounds = array<i64: 128, 128>}, {pipeline_mode = #tpu.pipeline_mode<synchronous>, transform_indices = @transform_4, window_bounds = array<i64: 1, 128>}, {pipeline_mode = #tpu.pipeline_mode<synchronous>, transform_indices = @transform_5, window_bounds = array<i64: 128, 128>}, {pipeline_mode = #tpu.pipeline_mode<synchronous>, transform_indices = @transform_6, window_bounds = array<i64: 1, 128>}, {transform_indices = @transform_7, window_bounds = array<i64: 8, 128>}]} {
    %c0 = arith.constant 0 : index
    %c0_0 = arith.constant 0 : index
    %0 = vector.load %arg1[%c0, %c0_0] : memref<8x128xf32, #tpu.memory_space<vmem>>, vector<8x128xf32>
    %c0_1 = arith.constant 0 : index
    %c0_2 = arith.constant 0 : index
    %1 = vector.load %arg2[%c0_1, %c0_2] : memref<128x128xf32, #tpu.memory_space<vmem>>, vector<128x128xf32>
    %c0_3 = arith.constant 0 : index
    %c0_4 = arith.constant 0 : index
    %2 = vector.load %arg3[%c0_3, %c0_4] : memref<1x128xf32, #tpu.memory_space<vmem>>, vector<1x128xf32>
    %cst = arith.constant dense<0.000000e+00> : vector<8x128xf32>
    %3 = tpu.matmul %0, %1, %cst {dimension_numbers = #tpu.dot_dimension_numbers<[1], [0], [0], [1], [0, 0, 1, 1], [], []>} : vector<8x128xf32>, vector<128x128xf32>, vector<8x128xf32> -> vector<8x128xf32>
    %4 = vector.broadcast %2 : vector<1x128xf32> to vector<8x128xf32>
    %5 = arith.addf %3, %4 : vector<8x128xf32>
    %6 = math.tanh %5 : vector<8x128xf32>
    %c0_5 = arith.constant 0 : index
    %c0_6 = arith.constant 0 : index
    %7 = vector.load %arg4[%c0_5, %c0_6] : memref<128x128xf32, #tpu.memory_space<vmem>>, vector<128x128xf32>
    %c0_7 = arith.constant 0 : index
    %c0_8 = arith.constant 0 : index
    %8 = vector.load %arg5[%c0_7, %c0_8] : memref<1x128xf32, #tpu.memory_space<vmem>>, vector<1x128xf32>
    %cst_9 = arith.constant dense<0.000000e+00> : vector<8x128xf32>
    %9 = tpu.matmul %6, %7, %cst_9 {dimension_numbers = #tpu.dot_dimension_numbers<[1], [0], [0], [1], [0, 0, 1, 1], [], []>} : vector<8x128xf32>, vector<128x128xf32>, vector<8x128xf32> -> vector<8x128xf32>
    %10 = vector.broadcast %8 : vector<1x128xf32> to vector<8x128xf32>
    %11 = arith.addf %9, %10 : vector<8x128xf32>
    %12 = math.tanh %11 : vector<8x128xf32>
    %c0_10 = arith.constant 0 : index
    %c0_11 = arith.constant 0 : index
    %13 = vector.load %arg6[%c0_10, %c0_11] : memref<128x128xf32, #tpu.memory_space<vmem>>, vector<128x128xf32>
    %c0_12 = arith.constant 0 : index
    %c0_13 = arith.constant 0 : index
    %14 = vector.load %arg7[%c0_12, %c0_13] : memref<1x128xf32, #tpu.memory_space<vmem>>, vector<1x128xf32>
    %cst_14 = arith.constant dense<0.000000e+00> : vector<8x128xf32>
    %15 = tpu.matmul %12, %13, %cst_14 {dimension_numbers = #tpu.dot_dimension_numbers<[1], [0], [0], [1], [0, 0, 1, 1], [], []>} : vector<8x128xf32>, vector<128x128xf32>, vector<8x128xf32> -> vector<8x128xf32>
    %16 = vector.broadcast %14 : vector<1x128xf32> to vector<8x128xf32>
    %17 = arith.addf %15, %16 : vector<8x128xf32>
    %18 = math.tanh %17 : vector<8x128xf32>
    %cst_15 = arith.constant 5.000000e-01 : f32
    %19 = vector.broadcast %cst_15 : f32 to vector<8x128xf32>
    %20 = arith.mulf %19, %18 : vector<8x128xf32>
    %21 = math.tanh %20 : vector<8x128xf32>
    %cst_16 = arith.constant 5.000000e-01 : f32
    %22 = vector.broadcast %cst_16 : f32 to vector<8x128xf32>
    %23 = arith.mulf %22, %21 : vector<8x128xf32>
    %cst_17 = arith.constant 5.000000e-01 : f32
    %24 = vector.broadcast %cst_17 : f32 to vector<8x128xf32>
    %25 = arith.addf %23, %24 : vector<8x128xf32>
    %c0_18 = arith.constant 0 : index
    %c0_19 = arith.constant 0 : index
    %26 = vector.load %arg8[%c0_18, %c0_19] : memref<8x128xf32, #tpu.memory_space<vmem>>, vector<8x128xf32>
    tpu.vector_store %arg8[%c0_18, %c0_19], %25 {strides = array<i32>} : memref<8x128xf32, #tpu.memory_space<vmem>>, vector<8x128xf32>,
    return
  }
  func.func @transform_0(%arg0: i32) -> (i32, i32) {
    %c0_i32 = arith.constant 0 : i32
    %c0_i32_0 = arith.constant 0 : i32
    return %arg0, %c0_i32 : i32, i32
  }
  func.func @transform_1(%arg0: i32) -> (i32, i32) {
    %c0_i32 = arith.constant 0 : i32
    %c0_i32_0 = arith.constant 0 : i32
    %c0_i32_1 = arith.constant 0 : i32
    return %c0_i32, %c0_i32_0 : i32, i32
  }
  func.func @transform_2(%arg0: i32) -> (i32, i32) {
    %c0_i32 = arith.constant 0 : i32
    %c0_i32_0 = arith.constant 0 : i32
    %c0_i32_1 = arith.constant 0 : i32
    return %c0_i32, %c0_i32_0 : i32, i32
  }
  func.func @transform_3(%arg0: i32) -> (i32, i32) {
    %c0_i32 = arith.constant 0 : i32
    %c0_i32_0 = arith.constant 0 : i32
    %c0_i32_1 = arith.constant 0 : i32
    return %c0_i32, %c0_i32_0 : i32, i32
  }
  func.func @transform_4(%arg0: i32) -> (i32, i32) {
    %c0_i32 = arith.constant 0 : i32
    %c0_i32_0 = arith.constant 0 : i32
    %c0_i32_1 = arith.constant 0 : i32
    return %c0_i32, %c0_i32_0 : i32, i32
  }
  func.func @transform_5(%arg0: i32) -> (i32, i32) {
    %c0_i32 = arith.constant 0 : i32
    %c0_i32_0 = arith.constant 0 : i32
    %c0_i32_1 = arith.constant 0 : i32
    return %c0_i32, %c0_i32_0 : i32, i32
  }
  func.func @transform_6(%arg0: i32) -> (i32, i32) {
    %c0_i32 = arith.constant 0 : i32
    %c0_i32_0 = arith.constant 0 : i32
    %c0_i32_1 = arith.constant 0 : i32
    return %c0_i32, %c0_i32_0 : i32, i32
  }
  func.func @transform_7(%arg0: i32) -> (i32, i32) {
    %c0_i32 = arith.constant 0 : i32
    %c0_i32_0 = arith.constant 0 : i32
    return %arg0, %c0_i32 : i32, i32
  }
}

module attributes {stable_mosaic.version = 11 : i64} {
  func.func @_fused_mlp_kernel(%arg0: i32, %arg1: memref<8x128xf32, #tpu.memory_space<vmem>>, %arg2: memref<128x128xf32, #tpu.memory_space<vmem>>, %arg3: memref<1x128xf32, #tpu.memory_space<vmem>>, %arg4: memref<128x128xf32, #tpu.memory_space<vmem>>, %arg5: memref<1x128xf32, #tpu.memory_space<vmem>>, %arg6: memref<128x128xf32, #tpu.memory_space<vmem>>, %arg7: memref<1x128xf32, #tpu.memory_space<vmem>>, %arg8: memref<8x128xf32, #tpu.memory_space<vmem>>) attributes {dimension_semantics = [#tpu.dimension_semantics<parallel>], iteration_bounds = array<i64: 1>, scalar_prefetch = 0 : i64, scratch_operands = 0 : i64, tpu.core_type = #tpu.core_type<tc>, window_params = [{transform_indices = @transform_0, window_bounds = array<i64: 8, 128>}, {pipeline_mode = #tpu.pipeline_mode<synchronous>, transform_indices = @transform_1, window_bounds = array<i64: 128, 128>}, {pipeline_mode = #tpu.pipeline_mode<synchronous>, transform_indices = @transform_2, window_bounds = array<i64: 1, 128>}, {pipeline_mode = #tpu.pipeline_mode<synchronous>, transform_indices = @transform_3, window_bounds = array<i64: 128, 128>}, {pipeline_mode = #tpu.pipeline_mode<synchronous>, transform_indices = @transform_4, window_bounds = array<i64: 1, 128>}, {pipeline_mode = #tpu.pipeline_mode<synchronous>, transform_indices = @transform_5, window_bounds = array<i64: 128, 128>}, {pipeline_mode = #tpu.pipeline_mode<synchronous>, transform_indices = @transform_6, window_bounds = array<i64: 1, 128>}, {transform_indices = @transform_7, window_bounds = array<i64: 8, 128>}]} {
    %c0 = arith.constant 0 : index
    %c0_0 = arith.constant 0 : index
    %0 = vector.load %arg1[%c0, %c0_0] : memref<8x128xf32, #tpu.memory_space<vmem>>, vector<8x128xf32>
    %c0_1 = arith.constant 0 : index
    %c0_2 = arith.constant 0 : index
    %1 = vector.load %arg2[%c0_1, %c0_2] : memref<128x128xf32, #tpu.memory_space<vmem>>, vector<128x128xf32>
    %c0_3 = arith.constant 0 : index
    %c0_4 = arith.constant 0 : index
    %2 = vector.load %arg3[%c0_3, %c0_4] : memref<1x128xf32, #tpu.memory_space<vmem>>, vector<1x128xf32>
    %cst = arith.constant dense<0.000000e+00> : vector<8x128xf32>
    %3 = tpu.matmul %0, %1, %cst {dimension_numbers = #tpu.dot_dimension_numbers<[1], [0], [0], [1], [0, 0, 1, 1], [], []>} : vector<8x128xf32>, vector<128x128xf32>, vector<8x128xf32> -> vector<8x128xf32>
    %4 = vector.broadcast %2 : vector<1x128xf32> to vector<8x128xf32>
    %5 = arith.addf %3, %4 : vector<8x128xf32>
    %6 = math.tanh %5 : vector<8x128xf32>
    %c0_5 = arith.constant 0 : index
    %c0_6 = arith.constant 0 : index
    %7 = vector.load %arg4[%c0_5, %c0_6] : memref<128x128xf32, #tpu.memory_space<vmem>>, vector<128x128xf32>
    %c0_7 = arith.constant 0 : index
    %c0_8 = arith.constant 0 : index
    %8 = vector.load %arg5[%c0_7, %c0_8] : memref<1x128xf32, #tpu.memory_space<vmem>>, vector<1x128xf32>
    %cst_9 = arith.constant dense<0.000000e+00> : vector<8x128xf32>
    %9 = tpu.matmul %6, %7, %cst_9 {dimension_numbers = #tpu.dot_dimension_numbers<[1], [0], [0], [1], [0, 0, 1, 1], [], []>} : vector<8x128xf32>, vector<128x128xf32>, vector<8x128xf32> -> vector<8x128xf32>
    %10 = vector.broadcast %8 : vector<1x128xf32> to vector<8x128xf32>
    %11 = arith.addf %9, %10 : vector<8x128xf32>
    %12 = math.tanh %11 : vector<8x128xf32>
    %c0_10 = arith.constant 0 : index
    %c0_11 = arith.constant 0 : index
    %13 = vector.load %arg6[%c0_10, %c0_11] : memref<128x128xf32, #tpu.memory_space<vmem>>, vector<128x128xf32>
    %c0_12 = arith.constant 0 : index
    %c0_13 = arith.constant 0 : index
    %14 = vector.load %arg7[%c0_12, %c0_13] : memref<1x128xf32, #tpu.memory_space<vmem>>, vector<1x128xf32>
    %cst_14 = arith.constant dense<0.000000e+00> : vector<8x128xf32>
    %15 = tpu.matmul %12, %13, %cst_14 {dimension_numbers = #tpu.dot_dimension_numbers<[1], [0], [0], [1], [0, 0, 1, 1], [], []>} : vector<8x128xf32>, vector<128x128xf32>, vector<8x128xf32> -> vector<8x128xf32>
    %16 = vector.broadcast %14 : vector<1x128xf32> to vector<8x128xf32>
    %17 = arith.addf %15, %16 : vector<8x128xf32>
    %18 = math.tanh %17 : vector<8x128xf32>
    %cst_15 = arith.constant 5.000000e-01 : f32
    %19 = vector.broadcast %cst_15 : f32 to vector<8x128xf32>
    %20 = arith.mulf %19, %18 : vector<8x128xf32>
    %21 = math.tanh %20 : vector<8x128xf32>
    %cst_16 = arith.constant 5.000000e-01 : f32
    %22 = vector.broadcast %cst_16 : f32 to vector<8x128xf32>
    %23 = arith.mulf %22, %21 : vector<8x128xf32>
    %cst_17 = arith.constant 5.000000e-01 : f32
    %24 = vector.broadcast %cst_17 : f32 to vector<8x128xf32>
    %25 = arith.addf %23, %24 : vector<8x128xf32>
    %c0_18 = arith.constant 0 : index
    %c0_19 = arith.constant 0 : index
    %26 = vector.load %arg8[%c0_18, %c0_19] : memref<8x128xf32, #tpu.memory_space<vmem>>, vector<8x128xf32>
    tpu.vector_store %arg8[%c0_18, %c0_19], %25 {strides = array<i32>} : memref<8x128xf32, #tpu.memory_space<vmem>>, vector<8x128xf32>,
    return
  }
  func.func @transform_0(%arg0: i32) -> (i32, i32) {
    %c0_i32 = arith.constant 0 : i32
    %c0_i32_0 = arith.constant 0 : i32
    return %arg0, %c0_i32 : i32, i32
  }
  func.func @transform_1(%arg0: i32) -> (i32, i32) {
    %c0_i32 = arith.constant 0 : i32
    %c0_i32_0 = arith.constant 0 : i32
    %c0_i32_1 = arith.constant 0 : i32
    return %c0_i32, %c0_i32_0 : i32, i32
  }
  func.func @transform_2(%arg0: i32) -> (i32, i32) {
    %c0_i32 = arith.constant 0 : i32
    %c0_i32_0 = arith.constant 0 : i32
    %c0_i32_1 = arith.constant 0 : i32
    return %c0_i32, %c0_i32_0 : i32, i32
  }
  func.func @transform_3(%arg0: i32) -> (i32, i32) {
    %c0_i32 = arith.constant 0 : i32
    %c0_i32_0 = arith.constant 0 : i32
    %c0_i32_1 = arith.constant 0 : i32
    return %c0_i32, %c0_i32_0 : i32, i32
  }
  func.func @transform_4(%arg0: i32) -> (i32, i32) {
    %c0_i32 = arith.constant 0 : i32
    %c0_i32_0 = arith.constant 0 : i32
    %c0_i32_1 = arith.constant 0 : i32
    return %c0_i32, %c0_i32_0 : i32, i32
  }
  func.func @transform_5(%arg0: i32) -> (i32, i32) {
    %c0_i32 = arith.constant 0 : i32
    %c0_i32_0 = arith.constant 0 : i32
    %c0_i32_1 = arith.constant 0 : i32
    return %c0_i32, %c0_i32_0 : i32, i32
  }
  func.func @transform_6(%arg0: i32) -> (i32, i32) {
    %c0_i32 = arith.constant 0 : i32
    %c0_i32_0 = arith.constant 0 : i32
    %c0_i32_1 = arith.constant 0 : i32
    return %c0_i32, %c0_i32_0 : i32, i32
  }
  func.func @transform_7(%arg0: i32) -> (i32, i32) {
    %c0_i32 = arith.constant 0 : i32
    %c0_i32_0 = arith.constant 0 : i32
    return %arg0, %c0_i32 : i32, i32
  }
}

</mosaic_0001>

<bundles_post_ra>
// kernel: tpu_custom_call.1
= control target key start
LH: loop header
LB: loop body
LE: loop exit
PB: predicated region body
PF: predicated region fallthrough
CT: control target
= control target key end

     0   :  { %12 = vsyncpa [#allocation3], 0  ;;  %s910_s0 = inlined_call_operand.hbm [shape: f32[8,128], index: 0, kind: input, shape index: {}]   ;;  %s911_s1 = inlined_call_operand.hbm [shape: f32[128,128], index: 1, kind: input, shape index: {}]   ;;  %s912_s2 = inlined_call_operand.vmem [shape: f32[1,128], index: 2, kind: input, shape index: {}]   ;;  %s913_s3 = inlined_call_operand.hbm [shape: f32[128,128], index: 3, kind: input, shape index: {}]   ;;  %s914_s4 = inlined_call_operand.vmem [shape: f32[1,128], index: 4, kind: input, shape index: {}]   ;;  %s915_s5 = inlined_call_operand.hbm [shape: f32[128,128], index: 5, kind: input, shape index: {}]   ;;  %s916_s6 = inlined_call_operand.vmem [shape: f32[1,128], index: 6, kind: input, shape index: {}]   ;;  %s917_s7 = inlined_call_operand.hbm [shape: f32[8,128], index: 7, kind: output, shape index: {}]  }
   0x1   :  { %13 = vsyncpa [#allocation6], 0 }
   0x2   :  { %14 = vsyncpa [#allocation9], 0 }
   0x3   :  { %15 = vsyncpa [#allocation4], 0  ;;  %s752_s24 = smov [#allocation5]   ;;  %s634_s28 = scalar_lea.hbm %s911_s1, 2048 }
   0x4   :  { %s31_s25 = sshll.u32 %s752_s24, 4  ;;  %p635_p0 = scmp.ne.s32.totalorder %s911_s1, %s634_s28  ;;  %s32_s25 = int_to_ptr.vmem [resolvable:$true] %s31_s25 }
   0x5   :  { %p638_p1 = scmp.lt.u32.totalorder %s634_s28, %s911_s1 }
   0x7   :  { %p640_p2 = pnand %p638_p1, %p635_p0 }
   0x9   :  { %643 = shalt.err (!%p640_p2)
}
   0xa   :  { %s644_s10 = scalar_lea.vmem %s32_s25, 2048  ;;  %p649_p4 = scmp.lt.s32.totalorder %s32_s25, %s32_s25 }
   0xb   :  { %p645_p3 = scmp.ne.s32.totalorder %s32_s25, %s644_s10  ;;  %p650_p5 = scmp.lt.s32.totalorder %s644_s10, %s644_s10 }
   0xd   :  { %p651_p6 = por %p650_p5, %p649_p4 }
   0xf   :  { %p652_p7 = pnand %p651_p6, %p645_p3 }
  0x11   :  { %655 = shalt.err (!%p652_p7)
}
  0x12   :  { %s753_s11 = smov 128   ;;  %s754_s12 = smov 8  }
  0x13   :  { %37 = dma.hbm_to_vmem [thread:$0]  %s911_s1, 2048, %s32_s25, [#allocation6], %s753_s11, %s753_s11, %s754_s12  }
  0x14   :  { %s755_s15 = smov [#allocation2]   ;;  %s756_s17 = smov [#allocation7]  }
  0x15   :  { %s22_s16 = sshll.u32 %s755_s15, 4  ;;  %s45_s18 = sshll.u32 %s756_s17, 4  ;;  %s23_s16 = int_to_ptr.vmem [resolvable:$true] %s22_s16  ;;  %s46_s18 = int_to_ptr.vmem [resolvable:$true] %s45_s18 }
  0x16   :  { %s656_s21 = scalar_lea.hbm %s910_s0, 128 }
  0x17   :  { %p657_p8 = scmp.ne.s32.totalorder %s910_s0, %s656_s21  ;;  %p660_p9 = scmp.lt.u32.totalorder %s656_s21, %s910_s0 }
  0x19   :  { %p662_p10 = pnand %p660_p9, %p657_p8 }
  0x1b   :  { %665 = shalt.err (!%p662_p10)
}
  0x1c   :  { %s666_s1 = scalar_lea.vmem %s23_s16, 128  ;;  %p671_p12 = scmp.lt.s32.totalorder %s23_s16, %s23_s16 }
  0x1d   :  { %p667_p11 = scmp.ne.s32.totalorder %s23_s16, %s666_s1  ;;  %p672_p13 = scmp.lt.s32.totalorder %s666_s1, %s666_s1 }
  0x1f   :  { %p673_p0 = por %p672_p13, %p671_p12 }
  0x21   :  { %p674_p1 = pnand %p673_p0, %p667_p11 }
  0x23   :  { %677 = shalt.err (!%p674_p1)
}
  0x24   :  { %25 = dma.hbm_to_vmem [thread:$0]  %s910_s0, 128, %s23_s16, [#allocation3]  }
  0x25   :  { %s678_s30 = scalar_lea.hbm %s913_s3, 2048 }
  0x26   :  { %p679_p2 = scmp.ne.s32.totalorder %s913_s3, %s678_s30  ;;  %p682_p3 = scmp.lt.u32.totalorder %s678_s30, %s913_s3 }
  0x28   :  { %p684_p4 = pnand %p682_p3, %p679_p2 }
  0x2a   :  { %687 = shalt.err (!%p684_p4)
}
  0x2b   :  { %s688_s14 = scalar_lea.vmem %s46_s18, 2048  ;;  %p693_p6 = scmp.lt.s32.totalorder %s46_s18, %s46_s18 }
  0x2c   :  { %p689_p5 = scmp.ne.s32.totalorder %s46_s18, %s688_s14  ;;  %p694_p7 = scmp.lt.s32.totalorder %s688_s14, %s688_s14 }
  0x2e   :  { %p695_p8 = por %p694_p7, %p693_p6 }
  0x30   :  { %p696_p9 = pnand %p695_p8, %p689_p5 }
  0x32   :  { %699 = shalt.err (!%p696_p9)
}
  0x33   :  { %51 = dma.hbm_to_vmem [thread:$0]  %s913_s3, 2048, %s46_s18, [#allocation6], %s753_s11, %s753_s11, %s754_s12  }
  0x34   :  { %s757_s16 = smov [#allocation8]   ;;  %s700_s21 = scalar_lea.hbm %s915_s5, 2048 }
  0x35   :  { %s59_s17 = sshll.u32 %s757_s16, 4  ;;  %p701_p10 = scmp.ne.s32.totalorder %s915_s5, %s700_s21  ;;  %s60_s17 = int_to_ptr.vmem [resolvable:$true] %s59_s17 }
  0x36   :  { %p704_p11 = scmp.lt.u32.totalorder %s700_s21, %s915_s5 }
  0x38   :  { %p706_p12 = pnand %p704_p11, %p701_p10 }
  0x3a   :  { %709 = shalt.err (!%p706_p12)
}
  0x3b   :  { %s710_s1 = scalar_lea.vmem %s60_s17, 2048  ;;  %p715_p0 = scmp.lt.s32.totalorder %s60_s17, %s60_s17 }
  0x3c   :  { %p711_p13 = scmp.ne.s32.totalorder %s60_s17, %s710_s1  ;;  %p716_p1 = scmp.lt.s32.totalorder %s710_s1, %s710_s1 }
  0x3e   :  { %p717_p2 = por %p716_p1, %p715_p0 }
  0x40   :  { %p718_p3 = pnand %p717_p2, %p711_p13 }
  0x42   :  { %721 = shalt.err (!%p718_p3)
}
  0x43   :  { %65 = dma.hbm_to_vmem [thread:$0]  %s915_s5, 2048, %s60_s17, [#allocation9], %s753_s11, %s753_s11, %s754_s12  }
  0x44   :  { %744 = dma.done.wait [#allocation3], 128  }
  0x45   :  { %745 = vsyncadd [#allocation3], 4294967168 }
  0x46   :  { %746 = dma.done.wait [#allocation6], 4096  }
  0x47   :  { %747 = vsyncadd [#allocation6], 4294963200 }
  0x48   :  { %748 = dma.done.wait [#allocation9], 2048  }
  0x49   :  { %749 = vsyncadd [#allocation9], 4294965248  ;;  %v758_v0 = vmov 0.0|0.0   ;;  %vm759_vm0 = vmmov 0   ;;  %v760_v1 = vmov 0.0   ;;  %v81_v2 = vld [vmem:[#allocation5] sm:$0xff] }
  0x4a   :  { %544 = vmatprep.subr.bf16.mxu0 %v758_v0  ;;  %471 = vmatprep.mubr.msk.f32.mxu0 %vm759_vm0, %v760_v1  ;;  %v82_v3 = vld [vmem:[#allocation5 + $0x8] sm:$0xff]  ;;  %v83_v4 = vld [vmem:[#allocation5 + $0x10] sm:$0xff]  ;;  %v84_v6 = vld [vmem:[#allocation5 + $0x18] sm:$0xff]  ;;  %s761_s28 = smov [#allocation10]  }
  0x4b   :  { %568 = vmatprep.subr.bf16.mxu1 %v758_v0  ;;  %506 = vmatprep.mubr.msk.f32.mxu1 %vm759_vm0, %v760_v1  ;;  %v545_v5 = vpack.c.bf16 %v82_v3, %v81_v2  ;;  %v548_v7 = vpack.c.bf16 %v84_v6, %v83_v4  ;;  %v85_v8 = vld [vmem:[#allocation5 + $0x20] sm:$0xff]  ;;  %v86_v9 = vld [vmem:[#allocation5 + $0x28] sm:$0xff]  ;;  %v177_v12 = vld [vmem:[#allocation7 + $0x10] sm:$0xff] }
  0x4c   :  { %v175_v10 = vld [vmem:[#allocation7] sm:$0xff]  ;;  %v176_v11 = vld [vmem:[#allocation7 + $0x8] sm:$0xff]  ;;  %v178_v13 = vld [vmem:[#allocation7 + $0x18] sm:$0xff]  ;;  %v551_v14 = vpack.c.bf16 %v86_v9, %v85_v8 }
  0x4d   :  { %546 = vmatpush3.bf16.msra.mxu0 %v545_v5  ;;  %v569_v15 = vpack.c.bf16 %v176_v11, %v175_v10  ;;  %v87_v16 = vld [vmem:[#allocation5 + $0x30] sm:$0xff]  ;;  %v88_v17 = vld [vmem:[#allocation5 + $0x38] sm:$0xff]  ;;  %v572_v18 = vpack.c.bf16 %v178_v13, %v177_v12  ;;  %v179_v19 = vld [vmem:[#allocation7 + $0x20] sm:$0xff] }
  0x4e   :  { %547 = vmatprep.subr.bf16.mxu0 %v758_v0  ;;  %v180_v20 = vld [vmem:[#allocation7 + $0x28] sm:$0xff]  ;;  %v554_v21 = vpack.c.bf16 %v88_v17, %v87_v16  ;;  %v89_v22 = vld [vmem:[#allocation5 + $0x40] sm:$0xff]  ;;  %v181_v25 = vld [vmem:[#allocation7 + $0x30] sm:$0xff] }
  0x4f   :  { %570 = vmatpush3.bf16.msra.mxu1 %v569_v15  ;;  %v90_v23 = vld [vmem:[#allocation5 + $0x48] sm:$0xff]  ;;  %v575_v24 = vpack.c.bf16 %v180_v20, %v179_v19  ;;  %v182_v26 = vld [vmem:[#allocation7 + $0x38] sm:$0xff]  ;;  %v91_v28 = vld [vmem:[#allocation5 + $0x50] sm:$0xff] }
  0x50   :  { %571 = vmatprep.subr.bf16.mxu1 %v758_v0  ;;  %v557_v27 = vpack.c.bf16 %v90_v23, %v89_v22  ;;  %v92_v29 = vld [vmem:[#allocation5 + $0x58] sm:$0xff]  ;;  %v578_v30 = vpack.c.bf16 %v182_v26, %v181_v25  ;;  %v183_v31 = vld [vmem:[#allocation7 + $0x40] sm:$0xff]  ;;  %v184_v32 = vld [vmem:[#allocation7 + $0x48] sm:$0xff] }
  0x51   :  { %549 = vmatpush3.bf16.msra.mxu0 %v548_v7  ;;  %v560_v33 = vpack.c.bf16 %v92_v29, %v91_v28  ;;  %v93_v34 = vld [vmem:[#allocation5 + $0x60] sm:$0xff]  ;;  %v94_v35 = vld [vmem:[#allocation5 + $0x68] sm:$0xff]  ;;  %v581_v36 = vpack.c.bf16 %v184_v32, %v183_v31  ;;  %v95_v38 = vld [vmem:[#allocation5 + $0x70] sm:$0xff] }
  0x52   :  { %550 = vmatprep.subr.bf16.mxu0 %v758_v0  ;;  %v563_v37 = vpack.c.bf16 %v94_v35, %v93_v34  ;;  %v96_v39 = vld [vmem:[#allocation5 + $0x78] sm:$0xff]  ;;  %v185_v42 = vld [vmem:[#allocation7 + $0x50] sm:$0xff]  ;;  %v187_v45 = vld [vmem:[#allocation7 + $0x60] sm:$0xff] }
  0x53   :  { %573 = vmatpush3.bf16.msra.mxu1 %v572_v18  ;;  %v566_v40 = vpack.c.bf16 %v96_v39, %v95_v38  ;;  %v80_v41 = vld [vmem:[#allocation2] sm:$0xff]  ;;  %v188_v46 = vld [vmem:[#allocation7 + $0x68] sm:$0xff]  ;;  %v189_v48 = vld [vmem:[#allocation7 + $0x70] sm:$0xff] }
  0x54   :  { %574 = vmatprep.subr.bf16.mxu1 %v758_v0  ;;  %v186_v43 = vld [vmem:[#allocation7 + $0x58] sm:$0xff]  ;;  %v587_v47 = vpack.c.bf16 %v188_v46, %v187_v45  ;;  %v269_v51 = vld [vmem:[#allocation8] sm:$0xff]  ;;  %v270_v52 = vld [vmem:[#allocation8 + $0x8] sm:$0xff] }
  0x55   :  { %552 = vmatpush3.bf16.msra.mxu0 %v551_v14  ;;  %v584_v44 = vpack.c.bf16 %v186_v43, %v185_v42  ;;  %v190_v49 = vld [vmem:[#allocation7 + $0x78] sm:$0xff]  ;;  %v271_v53 = vld [vmem:[#allocation8 + $0x10] sm:$0xff]  ;;  %v593_v54 = vpack.c.bf16 %v270_v52, %v269_v51  ;;  %v273_v57 = vld [vmem:[#allocation8 + $0x20] sm:$0xff] }
  0x56   :  { %553 = vmatprep.subr.bf16.mxu0 %v758_v0  ;;  %v590_v50 = vpack.c.bf16 %v190_v49, %v189_v48  ;;  %v272_v55 = vld [vmem:[#allocation8 + $0x18] sm:$0xff]  ;;  %v274_v58 = vld [vmem:[#allocation8 + $0x28] sm:$0xff]  ;;  %v275_v60 = vld [vmem:[#allocation8 + $0x30] sm:$0xff] }
  0x57   :  { %576 = vmatpush3.bf16.msra.mxu1 %v575_v24  ;;  %v596_v56 = vpack.c.bf16 %v272_v55, %v271_v53  ;;  %v599_v59 = vpack.c.bf16 %v274_v58, %v273_v57  ;;  %v276_v61 = vld [vmem:[#allocation8 + $0x38] sm:$0xff]  ;;  %v277_v63 = vld [vmem:[#allocation8 + $0x40] sm:$0xff]  ;;  %v279_v8 = vld [vmem:[#allocation8 + $0x50] sm:$0xff] }
  0x58   :  { %577 = vmatprep.subr.bf16.mxu1 %v758_v0  ;;  %v602_v62 = vpack.c.bf16 %v276_v61, %v275_v60  ;;  %v385_v3 = vld [vmem:[%s912_s2] ss:$0 sm:$0xff]  ;;  %v281_v11 = vld [vmem:[#allocation8 + $0x60] sm:$0xff]  ;;  %v282_v12 = vld [vmem:[#allocation8 + $0x68] sm:$0xff] }
  0x59   :  { %555 = vmatpush3.bf16.msra.mxu0 %v554_v21  ;;  %v280_v9 = vld [vmem:[#allocation8 + $0x58] sm:$0xff]  ;;  %v611_v13 = vpack.c.bf16 %v282_v12, %v281_v11  ;;  %v283_v14 = vld [vmem:[#allocation8 + $0x70] sm:$0xff] }
  0x5a   :  { %556 = vmatprep.subr.bf16.mxu0 %v758_v0  ;;  %v608_v10 = vpack.c.bf16 %v280_v9, %v279_v8  ;;  %v284_v15 = vld [vmem:[#allocation8 + $0x78] sm:$0xff] }
  0x5b   :  { %579 = vmatpush3.bf16.msra.mxu1 %v578_v30  ;;  %v614_v16 = vpack.c.bf16 %v284_v15, %v283_v14  ;;  %v386_v17 = vld [vmem:[%s914_s4] ss:$0 sm:$0xff]  ;;  %s374_s4 = sshll.u32 %s761_s28, 4  ;;  %s375_s4 = int_to_ptr.vmem [resolvable:$true] %s374_s4 }
  0x5c   :  { %580 = vmatprep.subr.bf16.mxu1 %v758_v0  ;;  %v387_v22 = vld [vmem:[%s916_s6] ss:$0 sm:$0xff]  ;;  %s722_s29 = scalar_lea.vmem %s375_s4, 128  ;;  %p727_p5 = scmp.lt.s32.totalorder %s375_s4, %s375_s4 }
  0x5d   :  { %558 = vmatpush3.bf16.msra.mxu0 %v557_v27  ;;  %p723_p4 = scmp.ne.s32.totalorder %s375_s4, %s722_s29  ;;  %p728_p6 = scmp.lt.s32.totalorder %s722_s29, %s722_s29 }
  0x5e   :  { %559 = vmatprep.subr.bf16.mxu0 %v758_v0 }
  0x5f   :  { %582 = vmatpush3.bf16.msra.mxu1 %v581_v36  ;;  %p729_p7 = por %p728_p6, %p727_p5 }
  0x60   :  { %583 = vmatprep.subr.bf16.mxu1 %v758_v0 }
  0x61   :  { %561 = vmatpush3.bf16.msra.mxu0 %v560_v33  ;;  %p730_p8 = pnand %p729_p7, %p723_p4 }
  0x62   :  { %562 = vmatprep.subr.bf16.mxu0 %v758_v0 }
  0x63   :  { %585 = vmatpush3.bf16.msra.mxu1 %v584_v44 }
  0x64   :  { %586 = vmatprep.subr.bf16.mxu1 %v758_v0 }
  0x65   :  { %564 = vmatpush3.bf16.msra.mxu0 %v563_v37 }
  0x66   :  { %565 = vmatprep.subr.bf16.mxu0 %v758_v0 }
  0x67   :  { %588 = vmatpush3.bf16.msra.mxu1 %v587_v47 }
  0x68   :  { %589 = vmatprep.subr.bf16.mxu1 %v758_v0 }
  0x69   :  { %567 = vmatpush3.bf16.msra.mxu0 %v566_v40 }
  0x6a   :  { %592 = vmatprep.subr.bf16.mxu0 %v758_v0 }
  0x6b   :  { %591 = vmatpush3.bf16.msra.mxu1 %v590_v50 }
  0x6c   :  { %472 = vmatmul.mubr.f32.vlgmr.msra.gmra.mrb[0].mxu0 %v80_v41 }
  0x6d   :  { %541 = vmatprep.mubr.msk.f32.mxu0 %vm759_vm0, %v760_v1  ;;  %594 = vmatpush3.bf16.msra.mxu0 %v593_v54  ;;  %v278_v1 = vld [vmem:[#allocation8 + $0x48] sm:$0xff] }
  0x6e   :  { %595 = vmatprep.subr.bf16.mxu0 %v758_v0  ;;  %v605_v2 = vpack.c.bf16 %v278_v1, %v277_v63 }
  0x71   :  { %597 = vmatpush3.bf16.msra.mxu0 %v596_v56 }
  0x72   :  { %598 = vmatprep.subr.bf16.mxu0 %v758_v0 }
  0x75   :  { %600 = vmatpush3.bf16.msra.mxu0 %v599_v59 }
  0x76   :  { %601 = vmatprep.subr.bf16.mxu0 %v758_v0 }
  0x79   :  { %603 = vmatpush3.bf16.msra.mxu0 %v602_v62 }
  0x7a   :  { %604 = vmatprep.subr.bf16.mxu0 %v758_v0 }
  0x7d   :  { %606 = vmatpush3.bf16.msra.mxu0 %v605_v2 }
  0x7e   :  { %607 = vmatprep.subr.bf16.mxu0 %v758_v0 }
  0x81   :  { %609 = vmatpush3.bf16.msra.mxu0 %v608_v10 }
  0x82   :  { %610 = vmatprep.subr.bf16.mxu0 %v758_v0 }
  0x85   :  { %612 = vmatpush3.bf16.msra.mxu0 %v611_v13 }
  0x86   :  { %613 = vmatprep.subr.bf16.mxu0 %v758_v0 }
  0x89   :  { %615 = vmatpush3.bf16.msra.mxu0 %v614_v16 }
 0x13f   :  { %v170_v4 = vpop.f32.mrb[0].mxu0 }
 0x140   :  { %v171_v5 = vadd.f32 %v385_v3, %v170_v4  ;;  %v473_v6 = vpop.f32.mrb[1].mxu0 }
 0x142   :  { %626 = vtanh.f32 %v171_v5 }
 0x14c   :  { %v627_v7 = vpop.eup %626 }
 0x14d   :  { %507 = vmatmul.mubr.f32.vlgmr.msra.gmra.mrb[0].mxu1 %v627_v7 }
 0x220   :  { %v264_v18 = vpop.f32.mrb[0].mxu1 }
 0x221   :  { %v265_v19 = vadd.f32 %v386_v17, %v264_v18  ;;  %v508_v20 = vpop.f32.mrb[1].mxu1 }
 0x223   :  { %628 = vtanh.f32 %v265_v19 }
 0x22d   :  { %v629_v21 = vpop.eup %628 }
 0x22e   :  { %542 = vmatmul.mubr.f32.vlgmr.msra.gmra.mrb[2].mxu0 %v629_v21 }
 0x301   :  { %v358_v23 = vpop.f32.mrb[2].mxu0 }
 0x302   :  { %v359_v24 = vadd.f32 %v387_v22, %v358_v23  ;;  %v543_v25 = vpop.f32.mrb[3].mxu0 }
 0x304   :  { %630 = vtanh.f32 %v359_v24 }
 0x30e   :  { %v631_v0 = vpop.eup %630 }
 0x30f   :  { %v363_v26 = vmul.f32 0.5, %v631_v0 }
 0x311   :  { %632 = vtanh.f32 %v363_v26 }
 0x31b   :  { %v633_v27 = vpop.eup %632 }
 0x31c   :  { %v365_v28 = vmul.f32 0.5, %v633_v27 }
 0x31e   :  { %v366_v29 = vadd.f32 0.5, %v365_v28 }
 0x320   :  { %367 = vst [vmem:[#allocation10] sm:$0xff] %v366_v29 }
 0x321   :  { %733 = shalt.err (!%p730_p8)
}
 0x322   :  { %s734_s8 = scalar_lea.hbm %s917_s7, 128 }
 0x323   :  { %p735_p9 = scmp.ne.s32.totalorder %s917_s7, %s734_s8  ;;  %p738_p10 = scmp.lt.u32.totalorder %s734_s8, %s917_s7 }
 0x325   :  { %p740_p11 = pnand %p738_p10, %p735_p9 }
 0x327   :  { %743 = shalt.err (!%p740_p11)
}
 0x328   :  { %377 = dma.vmem_to_hbm [thread:$0]  %s375_s4, 128, %s917_s7, [#allocation4]  }
 0x329   :  { %750 = dma.done.wait [#allocation4], 128  }
 0x32a   :  { %751 = vsyncadd [#allocation4], 4294967168 }
 0x32b   :  { %381 = vsyncpa [#allocation3], 1 }
 0x32c   :  { %382 = vsyncpa [#allocation6], 1 }
 0x32d   :  { %383 = vsyncpa [#allocation9], 1 }
 0x32e   :  { %384 = vsyncpa [#allocation4], 1 }

// kernel: tpu_custom_call.1
= control target key start
LH: loop header
LB: loop body
LE: loop exit
PB: predicated region body
PF: predicated region fallthrough
CT: control target
= control target key end

     0   :  { %12 = vsyncpa [#allocation3], 0  ;;  %s910_s0 = inlined_call_operand.hbm [shape: f32[8,128], index: 0, kind: input, shape index: {}]   ;;  %s911_s1 = inlined_call_operand.hbm [shape: f32[128,128], index: 1, kind: input, shape index: {}]   ;;  %s912_s2 = inlined_call_operand.vmem [shape: f32[1,128], index: 2, kind: input, shape index: {}]   ;;  %s913_s3 = inlined_call_operand.hbm [shape: f32[128,128], index: 3, kind: input, shape index: {}]   ;;  %s914_s4 = inlined_call_operand.vmem [shape: f32[1,128], index: 4, kind: input, shape index: {}]   ;;  %s915_s5 = inlined_call_operand.hbm [shape: f32[128,128], index: 5, kind: input, shape index: {}]   ;;  %s916_s6 = inlined_call_operand.vmem [shape: f32[1,128], index: 6, kind: input, shape index: {}]   ;;  %s917_s7 = inlined_call_operand.hbm [shape: f32[8,128], index: 7, kind: output, shape index: {}]  }
   0x1   :  { %13 = vsyncpa [#allocation6], 0 }
   0x2   :  { %14 = vsyncpa [#allocation9], 0 }
   0x3   :  { %15 = vsyncpa [#allocation4], 0  ;;  %s752_s24 = smov [#allocation5]   ;;  %s634_s28 = scalar_lea.hbm %s911_s1, 2048 }
   0x4   :  { %s31_s25 = sshll.u32 %s752_s24, 4  ;;  %p635_p0 = scmp.ne.s32.totalorder %s911_s1, %s634_s28  ;;  %s32_s25 = int_to_ptr.vmem [resolvable:$true] %s31_s25 }
   0x5   :  { %p638_p1 = scmp.lt.u32.totalorder %s634_s28, %s911_s1 }
   0x7   :  { %p640_p2 = pnand %p638_p1, %p635_p0 }
   0x9   :  { %643 = shalt.err (!%p640_p2)
}
   0xa   :  { %s644_s10 = scalar_lea.vmem %s32_s25, 2048  ;;  %p649_p4 = scmp.lt.s32.totalorder %s32_s25, %s32_s25 }
   0xb   :  { %p645_p3 = scmp.ne.s32.totalorder %s32_s25, %s644_s10  ;;  %p650_p5 = scmp.lt.s32.totalorder %s644_s10, %s644_s10 }
   0xd   :  { %p651_p6 = por %p650_p5, %p649_p4 }
   0xf   :  { %p652_p7 = pnand %p651_p6, %p645_p3 }
  0x11   :  { %655 = shalt.err (!%p652_p7)
}
  0x12   :  { %s753_s11 = smov 128   ;;  %s754_s12 = smov 8  }
  0x13   :  { %37 = dma.hbm_to_vmem [thread:$0]  %s911_s1, 2048, %s32_s25, [#allocation6], %s753_s11, %s753_s11, %s754_s12  }
  0x14   :  { %s755_s15 = smov [#allocation2]   ;;  %s756_s17 = smov [#allocation7]  }
  0x15   :  { %s22_s16 = sshll.u32 %s755_s15, 4  ;;  %s45_s18 = sshll.u32 %s756_s17, 4  ;;  %s23_s16 = int_to_ptr.vmem [resolvable:$true] %s22_s16  ;;  %s46_s18 = int_to_ptr.vmem [resolvable:$true] %s45_s18 }
  0x16   :  { %s656_s21 = scalar_lea.hbm %s910_s0, 128 }
  0x17   :  { %p657_p8 = scmp.ne.s32.totalorder %s910_s0, %s656_s21  ;;  %p660_p9 = scmp.lt.u32.totalorder %s656_s21, %s910_s0 }
  0x19   :  { %p662_p10 = pnand %p660_p9, %p657_p8 }
  0x1b   :  { %665 = shalt.err (!%p662_p10)
}
  0x1c   :  { %s666_s1 = scalar_lea.vmem %s23_s16, 128  ;;  %p671_p12 = scmp.lt.s32.totalorder %s23_s16, %s23_s16 }
  0x1d   :  { %p667_p11 = scmp.ne.s32.totalorder %s23_s16, %s666_s1  ;;  %p672_p13 = scmp.lt.s32.totalorder %s666_s1, %s666_s1 }
  0x1f   :  { %p673_p0 = por %p672_p13, %p671_p12 }
  0x21   :  { %p674_p1 = pnand %p673_p0, %p667_p11 }
  0x23   :  { %677 = shalt.err (!%p674_p1)
}
  0x24   :  { %25 = dma.hbm_to_vmem [thread:$0]  %s910_s0, 128, %s23_s16, [#allocation3]  }
  0x25   :  { %s678_s30 = scalar_lea.hbm %s913_s3, 2048 }
  0x26   :  { %p679_p2 = scmp.ne.s32.totalorder %s913_s3, %s678_s30  ;;  %p682_p3 = scmp.lt.u32.totalorder %s678_s30, %s913_s3 }
  0x28   :  { %p684_p4 = pnand %p682_p3, %p679_p2 }
  0x2a   :  { %687 = shalt.err (!%p684_p4)
}
  0x2b   :  { %s688_s14 = scalar_lea.vmem %s46_s18, 2048  ;;  %p693_p6 = scmp.lt.s32.totalorder %s46_s18, %s46_s18 }
  0x2c   :  { %p689_p5 = scmp.ne.s32.totalorder %s46_s18, %s688_s14  ;;  %p694_p7 = scmp.lt.s32.totalorder %s688_s14, %s688_s14 }
  0x2e   :  { %p695_p8 = por %p694_p7, %p693_p6 }
  0x30   :  { %p696_p9 = pnand %p695_p8, %p689_p5 }
  0x32   :  { %699 = shalt.err (!%p696_p9)
}
  0x33   :  { %51 = dma.hbm_to_vmem [thread:$0]  %s913_s3, 2048, %s46_s18, [#allocation6], %s753_s11, %s753_s11, %s754_s12  }
  0x34   :  { %s757_s16 = smov [#allocation8]   ;;  %s700_s21 = scalar_lea.hbm %s915_s5, 2048 }
  0x35   :  { %s59_s17 = sshll.u32 %s757_s16, 4  ;;  %p701_p10 = scmp.ne.s32.totalorder %s915_s5, %s700_s21  ;;  %s60_s17 = int_to_ptr.vmem [resolvable:$true] %s59_s17 }
  0x36   :  { %p704_p11 = scmp.lt.u32.totalorder %s700_s21, %s915_s5 }
  0x38   :  { %p706_p12 = pnand %p704_p11, %p701_p10 }
  0x3a   :  { %709 = shalt.err (!%p706_p12)
}
  0x3b   :  { %s710_s1 = scalar_lea.vmem %s60_s17, 2048  ;;  %p715_p0 = scmp.lt.s32.totalorder %s60_s17, %s60_s17 }
  0x3c   :  { %p711_p13 = scmp.ne.s32.totalorder %s60_s17, %s710_s1  ;;  %p716_p1 = scmp.lt.s32.totalorder %s710_s1, %s710_s1 }
  0x3e   :  { %p717_p2 = por %p716_p1, %p715_p0 }
  0x40   :  { %p718_p3 = pnand %p717_p2, %p711_p13 }
  0x42   :  { %721 = shalt.err (!%p718_p3)
}
  0x43   :  { %65 = dma.hbm_to_vmem [thread:$0]  %s915_s5, 2048, %s60_s17, [#allocation9], %s753_s11, %s753_s11, %s754_s12  }
  0x44   :  { %744 = dma.done.wait [#allocation3], 128  }
  0x45   :  { %745 = vsyncadd [#allocation3], 4294967168 }
  0x46   :  { %746 = dma.done.wait [#allocation6], 4096  }
  0x47   :  { %747 = vsyncadd [#allocation6], 4294963200 }
  0x48   :  { %748 = dma.done.wait [#allocation9], 2048  }
  0x49   :  { %749 = vsyncadd [#allocation9], 4294965248  ;;  %v758_v0 = vmov 0.0|0.0   ;;  %vm759_vm0 = vmmov 0   ;;  %v760_v1 = vmov 0.0   ;;  %v81_v2 = vld [vmem:[#allocation5] sm:$0xff] }
  0x4a   :  { %544 = vmatprep.subr.bf16.mxu0 %v758_v0  ;;  %471 = vmatprep.mubr.msk.f32.mxu0 %vm759_vm0, %v760_v1  ;;  %v82_v3 = vld [vmem:[#allocation5 + $0x8] sm:$0xff]  ;;  %v83_v4 = vld [vmem:[#allocation5 + $0x10] sm:$0xff]  ;;  %v84_v6 = vld [vmem:[#allocation5 + $0x18] sm:$0xff]  ;;  %s761_s28 = smov [#allocation10]  }
  0x4b   :  { %568 = vmatprep.subr.bf16.mxu1 %v758_v0  ;;  %506 = vmatprep.mubr.msk.f32.mxu1 %vm759_vm0, %v760_v1  ;;  %v545_v5 = vpack.c.bf16 %v82_v3, %v81_v2  ;;  %v548_v7 = vpack.c.bf16 %v84_v6, %v83_v4  ;;  %v85_v8 = vld [vmem:[#allocation5 + $0x20] sm:$0xff]  ;;  %v86_v9 = vld [vmem:[#allocation5 + $0x28] sm:$0xff]  ;;  %v177_v12 = vld [vmem:[#allocation7 + $0x10] sm:$0xff] }
  0x4c   :  { %v175_v10 = vld [vmem:[#allocation7] sm:$0xff]  ;;  %v176_v11 = vld [vmem:[#allocation7 + $0x8] sm:$0xff]  ;;  %v178_v13 = vld [vmem:[#allocation7 + $0x18] sm:$0xff]  ;;  %v551_v14 = vpack.c.bf16 %v86_v9, %v85_v8 }
  0x4d   :  { %546 = vmatpush3.bf16.msra.mxu0 %v545_v5  ;;  %v569_v15 = vpack.c.bf16 %v176_v11, %v175_v10  ;;  %v87_v16 = vld [vmem:[#allocation5 + $0x30] sm:$0xff]  ;;  %v88_v17 = vld [vmem:[#allocation5 + $0x38] sm:$0xff]  ;;  %v572_v18 = vpack.c.bf16 %v178_v13, %v177_v12  ;;  %v179_v19 = vld [vmem:[#allocation7 + $0x20] sm:$0xff] }
  0x4e   :  { %547 = vmatprep.subr.bf16.mxu0 %v758_v0  ;;  %v180_v20 = vld [vmem:[#allocation7 + $0x28] sm:$0xff]  ;;  %v554_v21 = vpack.c.bf16 %v88_v17, %v87_v16  ;;  %v89_v22 = vld [vmem:[#allocation5 + $0x40] sm:$0xff]  ;;  %v181_v25 = vld [vmem:[#allocation7 + $0x30] sm:$0xff] }
  0x4f   :  { %570 = vmatpush3.bf16.msra.mxu1 %v569_v15  ;;  %v90_v23 = vld [vmem:[#allocation5 + $0x48] sm:$0xff]  ;;  %v575_v24 = vpack.c.bf16 %v180_v20, %v179_v19  ;;  %v182_v26 = vld [vmem:[#allocation7 + $0x38] sm:$0xff]  ;;  %v91_v28 = vld [vmem:[#allocation5 + $0x50] sm:$0xff] }
  0x50   :  { %571 = vmatprep.subr.bf16.mxu1 %v758_v0  ;;  %v557_v27 = vpack.c.bf16 %v90_v23, %v89_v22  ;;  %v92_v29 = vld [vmem:[#allocation5 + $0x58] sm:$0xff]  ;;  %v578_v30 = vpack.c.bf16 %v182_v26, %v181_v25  ;;  %v183_v31 = vld [vmem:[#allocation7 + $0x40] sm:$0xff]  ;;  %v184_v32 = vld [vmem:[#allocation7 + $0x48] sm:$0xff] }
  0x51   :  { %549 = vmatpush3.bf16.msra.mxu0 %v548_v7  ;;  %v560_v33 = vpack.c.bf16 %v92_v29, %v91_v28  ;;  %v93_v34 = vld [vmem:[#allocation5 + $0x60] sm:$0xff]  ;;  %v94_v35 = vld [vmem:[#allocation5 + $0x68] sm:$0xff]  ;;  %v581_v36 = vpack.c.bf16 %v184_v32, %v183_v31  ;;  %v95_v38 = vld [vmem:[#allocation5 + $0x70] sm:$0xff] }
  0x52   :  { %550 = vmatprep.subr.bf16.mxu0 %v758_v0  ;;  %v563_v37 = vpack.c.bf16 %v94_v35, %v93_v34  ;;  %v96_v39 = vld [vmem:[#allocation5 + $0x78] sm:$0xff]  ;;  %v185_v42 = vld [vmem:[#allocation7 + $0x50] sm:$0xff]  ;;  %v187_v45 = vld [vmem:[#allocation7 + $0x60] sm:$0xff] }
  0x53   :  { %573 = vmatpush3.bf16.msra.mxu1 %v572_v18  ;;  %v566_v40 = vpack.c.bf16 %v96_v39, %v95_v38  ;;  %v80_v41 = vld [vmem:[#allocation2] sm:$0xff]  ;;  %v188_v46 = vld [vmem:[#allocation7 + $0x68] sm:$0xff]  ;;  %v189_v48 = vld [vmem:[#allocation7 + $0x70] sm:$0xff] }
  0x54   :  { %574 = vmatprep.subr.bf16.mxu1 %v758_v0  ;;  %v186_v43 = vld [vmem:[#allocation7 + $0x58] sm:$0xff]  ;;  %v587_v47 = vpack.c.bf16 %v188_v46, %v187_v45  ;;  %v269_v51 = vld [vmem:[#allocation8] sm:$0xff]  ;;  %v270_v52 = vld [vmem:[#allocation8 + $0x8] sm:$0xff] }
  0x55   :  { %552 = vmatpush3.bf16.msra.mxu0 %v551_v14  ;;  %v584_v44 = vpack.c.bf16 %v186_v43, %v185_v42  ;;  %v190_v49 = vld [vmem:[#allocation7 + $0x78] sm:$0xff]  ;;  %v271_v53 = vld [vmem:[#allocation8 + $0x10] sm:$0xff]  ;;  %v593_v54 = vpack.c.bf16 %v270_v52, %v269_v51  ;;  %v273_v57 = vld [vmem:[#allocation8 + $0x20] sm:$0xff] }
  0x56   :  { %553 = vmatprep.subr.bf16.mxu0 %v758_v0  ;;  %v590_v50 = vpack.c.bf16 %v190_v49, %v189_v48  ;;  %v272_v55 = vld [vmem:[#allocation8 + $0x18] sm:$0xff]  ;;  %v274_v58 = vld [vmem:[#allocation8 + $0x28] sm:$0xff]  ;;  %v275_v60 = vld [vmem:[#allocation8 + $0x30] sm:$0xff] }
  0x57   :  { %576 = vmatpush3.bf16.msra.mxu1 %v575_v24  ;;  %v596_v56 = vpack.c.bf16 %v272_v55, %v271_v53  ;;  %v599_v59 = vpack.c.bf16 %v274_v58, %v273_v57  ;;  %v276_v61 = vld [vmem:[#allocation8 + $0x38] sm:$0xff]  ;;  %v277_v63 = vld [vmem:[#allocation8 + $0x40] sm:$0xff]  ;;  %v279_v8 = vld [vmem:[#allocation8 + $0x50] sm:$0xff] }
  0x58   :  { %577 = vmatprep.subr.bf16.mxu1 %v758_v0  ;;  %v602_v62 = vpack.c.bf16 %v276_v61, %v275_v60  ;;  %v385_v3 = vld [vmem:[%s912_s2] ss:$0 sm:$0xff]  ;;  %v281_v11 = vld [vmem:[#allocation8 + $0x60] sm:$0xff]  ;;  %v282_v12 = vld [vmem:[#allocation8 + $0x68] sm:$0xff] }
  0x59   :  { %555 = vmatpush3.bf16.msra.mxu0 %v554_v21  ;;  %v280_v9 = vld [vmem:[#allocation8 + $0x58] sm:$0xff]  ;;  %v611_v13 = vpack.c.bf16 %v282_v12, %v281_v11  ;;  %v283_v14 = vld [vmem:[#allocation8 + $0x70] sm:$0xff] }
  0x5a   :  { %556 = vmatprep.subr.bf16.mxu0 %v758_v0  ;;  %v608_v10 = vpack.c.bf16 %v280_v9, %v279_v8  ;;  %v284_v15 = vld [vmem:[#allocation8 + $0x78] sm:$0xff] }
  0x5b   :  { %579 = vmatpush3.bf16.msra.mxu1 %v578_v30  ;;  %v614_v16 = vpack.c.bf16 %v284_v15, %v283_v14  ;;  %v386_v17 = vld [vmem:[%s914_s4] ss:$0 sm:$0xff]  ;;  %s374_s4 = sshll.u32 %s761_s28, 4  ;;  %s375_s4 = int_to_ptr.vmem [resolvable:$true] %s374_s4 }
  0x5c   :  { %580 = vmatprep.subr.bf16.mxu1 %v758_v0  ;;  %v387_v22 = vld [vmem:[%s916_s6] ss:$0 sm:$0xff]  ;;  %s722_s29 = scalar_lea.vmem %s375_s4, 128  ;;  %p727_p5 = scmp.lt.s32.totalorder %s375_s4, %s375_s4 }
  0x5d   :  { %558 = vmatpush3.bf16.msra.mxu0 %v557_v27  ;;  %p723_p4 = scmp.ne.s32.totalorder %s375_s4, %s722_s29  ;;  %p728_p6 = scmp.lt.s32.totalorder %s722_s29, %s722_s29 }
  0x5e   :  { %559 = vmatprep.subr.bf16.mxu0 %v758_v0 }
  0x5f   :  { %582 = vmatpush3.bf16.msra.mxu1 %v581_v36  ;;  %p729_p7 = por %p728_p6, %p727_p5 }
  0x60   :  { %583 = vmatprep.subr.bf16.mxu1 %v758_v0 }
  0x61   :  { %561 = vmatpush3.bf16.msra.mxu0 %v560_v33  ;;  %p730_p8 = pnand %p729_p7, %p723_p4 }
  0x62   :  { %562 = vmatprep.subr.bf16.mxu0 %v758_v0 }
  0x63   :  { %585 = vmatpush3.bf16.msra.mxu1 %v584_v44 }
  0x64   :  { %586 = vmatprep.subr.bf16.mxu1 %v758_v0 }
  0x65   :  { %564 = vmatpush3.bf16.msra.mxu0 %v563_v37 }
  0x66   :  { %565 = vmatprep.subr.bf16.mxu0 %v758_v0 }
  0x67   :  { %588 = vmatpush3.bf16.msra.mxu1 %v587_v47 }
  0x68   :  { %589 = vmatprep.subr.bf16.mxu1 %v758_v0 }
  0x69   :  { %567 = vmatpush3.bf16.msra.mxu0 %v566_v40 }
  0x6a   :  { %592 = vmatprep.subr.bf16.mxu0 %v758_v0 }
  0x6b   :  { %591 = vmatpush3.bf16.msra.mxu1 %v590_v50 }
  0x6c   :  { %472 = vmatmul.mubr.f32.vlgmr.msra.gmra.mrb[0].mxu0 %v80_v41 }
  0x6d   :  { %541 = vmatprep.mubr.msk.f32.mxu0 %vm759_vm0, %v760_v1  ;;  %594 = vmatpush3.bf16.msra.mxu0 %v593_v54  ;;  %v278_v1 = vld [vmem:[#allocation8 + $0x48] sm:$0xff] }
  0x6e   :  { %595 = vmatprep.subr.bf16.mxu0 %v758_v0  ;;  %v605_v2 = vpack.c.bf16 %v278_v1, %v277_v63 }
  0x71   :  { %597 = vmatpush3.bf16.msra.mxu0 %v596_v56 }
  0x72   :  { %598 = vmatprep.subr.bf16.mxu0 %v758_v0 }
  0x75   :  { %600 = vmatpush3.bf16.msra.mxu0 %v599_v59 }
  0x76   :  { %601 = vmatprep.subr.bf16.mxu0 %v758_v0 }
  0x79   :  { %603 = vmatpush3.bf16.msra.mxu0 %v602_v62 }
  0x7a   :  { %604 = vmatprep.subr.bf16.mxu0 %v758_v0 }
  0x7d   :  { %606 = vmatpush3.bf16.msra.mxu0 %v605_v2 }
  0x7e   :  { %607 = vmatprep.subr.bf16.mxu0 %v758_v0 }
  0x81   :  { %609 = vmatpush3.bf16.msra.mxu0 %v608_v10 }
  0x82   :  { %610 = vmatprep.subr.bf16.mxu0 %v758_v0 }
  0x85   :  { %612 = vmatpush3.bf16.msra.mxu0 %v611_v13 }
  0x86   :  { %613 = vmatprep.subr.bf16.mxu0 %v758_v0 }
  0x89   :  { %615 = vmatpush3.bf16.msra.mxu0 %v614_v16 }
 0x13f   :  { %v170_v4 = vpop.f32.mrb[0].mxu0 }
 0x140   :  { %v171_v5 = vadd.f32 %v385_v3, %v170_v4  ;;  %v473_v6 = vpop.f32.mrb[1].mxu0 }
 0x142   :  { %626 = vtanh.f32 %v171_v5 }
 0x14c   :  { %v627_v7 = vpop.eup %626 }
 0x14d   :  { %507 = vmatmul.mubr.f32.vlgmr.msra.gmra.mrb[0].mxu1 %v627_v7 }
 0x220   :  { %v264_v18 = vpop.f32.mrb[0].mxu1 }
 0x221   :  { %v265_v19 = vadd.f32 %v386_v17, %v264_v18  ;;  %v508_v20 = vpop.f32.mrb[1].mxu1 }
 0x223   :  { %628 = vtanh.f32 %v265_v19 }
 0x22d   :  { %v629_v21 = vpop.eup %628 }
 0x22e   :  { %542 = vmatmul.mubr.f32.vlgmr.msra.gmra.mrb[2].mxu0 %v629_v21 }
 0x301   :  { %v358_v23 = vpop.f32.mrb[2].mxu0 }
 0x302   :  { %v359_v24 = vadd.f32 %v387_v22, %v358_v23  ;;  %v543_v25 = vpop.f32.mrb[3].mxu0 }
 0x304   :  { %630 = vtanh.f32 %v359_v24 }
 0x30e   :  { %v631_v0 = vpop.eup %630 }
 0x30f   :  { %v363_v26 = vmul.f32 0.5, %v631_v0 }
 0x311   :  { %632 = vtanh.f32 %v363_v26 }
 0x31b   :  { %v633_v27 = vpop.eup %632 }
 0x31c   :  { %v365_v28 = vmul.f32 0.5, %v633_v27 }
 0x31e   :  { %v366_v29 = vadd.f32 0.5, %v365_v28 }
 0x320   :  { %367 = vst [vmem:[#allocation10] sm:$0xff] %v366_v29 }
 0x321   :  { %733 = shalt.err (!%p730_p8)
}
 0x322   :  { %s734_s8 = scalar_lea.hbm %s917_s7, 128 }
 0x323   :  { %p735_p9 = scmp.ne.s32.totalorder %s917_s7, %s734_s8  ;;  %p738_p10 = scmp.lt.u32.totalorder %s734_s8, %s917_s7 }
 0x325   :  { %p740_p11 = pnand %p738_p10, %p735_p9 }
 0x327   :  { %743 = shalt.err (!%p740_p11)
}
 0x328   :  { %377 = dma.vmem_to_hbm [thread:$0]  %s375_s4, 128, %s917_s7, [#allocation4]  }
 0x329   :  { %750 = dma.done.wait [#allocation4], 128  }
 0x32a   :  { %751 = vsyncadd [#allocation4], 4294967168 }
 0x32b   :  { %381 = vsyncpa [#allocation3], 1 }
 0x32c   :  { %382 = vsyncpa [#allocation6], 1 }
 0x32d   :  { %383 = vsyncpa [#allocation9], 1 }
 0x32e   :  { %384 = vsyncpa [#allocation4], 1 }

</bundles_post_ra>
